<compile_context>
chip_gen: v5e
topology: v5e:2x2
jax: 0.10.0
libtpu: 0.0.40
codegen_flags: <defaults>
</compile_context>

<pallas_src>
import jax
import jax.numpy as jnp
from jax import lax
from jax.experimental import pallas as pl
from jax.experimental.pallas import tpu as pltpu


def _round_up(x, m):
    return (x + m - 1) // m * m


# --------------------------------------------------------------------------
# Phase 1: accumulate energy over HW tiles, then softmax -> attention (D, C)
# --------------------------------------------------------------------------
def _energy_kernel(x_ref, q_ref, w1_ref, b1_ref, attn_ref, acc_ref):
    t = pl.program_id(1)

    @pl.when(t == 0)
    def _():
        acc_ref[...] = jnp.zeros_like(acc_ref)

    x = x_ref[0]                      # (Cin, HWt)  lane-dense on HW
    q = q_ref[0]                      # (Dp,  HWt)

    # conv1 (1x1, BN folded) + ReLU computed directly in (C, HW) layout.
    key = jnp.dot(w1_ref[...], x, preferred_element_type=jnp.float32)
    key = jnp.maximum(key + b1_ref[...], 0.0)            # (C, HWt), bias (C,1)

    # energy tile: (Dp, HWt) x (C, HWt) contracted over HW -> (Dp, C).
    # No transpose is materialized (q @ key^T expressed via dot_general).
    acc_ref[...] += lax.dot_general(
        q, key.astype(q.dtype), (((1,), (1,)), ((), ())),
        preferred_element_type=jnp.float32)

    @pl.when(t == pl.num_programs(1) - 1)
    def _():
        energy = acc_ref[...]                            # (Dp, C), f32
        # softmax(rowmax(E) - E) == softmax(-E): one stabilizing max only.
        e = -energy
        e = e - jnp.max(e, axis=-1, keepdims=True)
        p = jnp.exp(e)
        # softmax runs once per batch on a tiny (Dp, C) tile; exact divide is
        # off the hot path (approx reciprocal not needed here).
        attn = p / jnp.sum(p, axis=-1, keepdims=True)
        attn_ref[0] = attn.astype(attn_ref.dtype)


# --------------------------------------------------------------------------
# Phase 2: out_tile = W2 @ (attn^T @ q_tile) + b2  per (C, HW_tile)
# --------------------------------------------------------------------------
def _output_kernel(attn_ref, q_ref, w2_ref, b2_ref, out_ref):
    q = q_ref[0]                                         # (Dp, HWt)
    attn = attn_ref[0].astype(q.dtype)                   # (Dp, C)

    # attention^T @ proj_value, contracting D with no explicit transpose.
    # NOTE: D is tiny (6..~20); if this matmul ever dominates, a VPU
    # broadcast-MAC over D is an alternative -- not needed at these shapes.
    out_att = lax.dot_general(
        attn, q, (((0,), (0,)), ((), ())),
        preferred_element_type=jnp.float32)              # (C, HWt)

    out = jnp.dot(w2_ref[...], out_att.astype(w2_ref.dtype),
                  preferred_element_type=jnp.float32) + b2_ref[...]
    out_ref[0] = out.astype(out_ref.dtype)


# --------------------------------------------------------------------------
# Wrapper
# --------------------------------------------------------------------------
def dfe_forward(feat_ffm, coarse_x, params, *, hw_tile=512, matmul_dtype=None):
    """feat_ffm: (N, Cin, H, W), coarse_x: (N, D, H, W) -> (N, C, H, W).

    hw_tile: HW tile size (rounded to a multiple of 128).  Size it against
             VMEM: ~2 buffers x (Cin + D + C) x hw_tile x itemsize must fit
             the scoped VMEM budget (64 MiB total on v7x, 128 MiB v5e/v6e).
    matmul_dtype: e.g. jnp.bfloat16 for production (f32 accumulation kept);
             None keeps the input dtype.
    """
    N, Cin, H, W = feat_ffm.shape
    _, D, _, _ = coarse_x.shape
    HW = H * W

    # ---- fold BN into conv1 weight/bias (inference semantics) -------------
    w1_conv = params["w1"]                               # (C, Cin)
    C = w1_conv.shape[0]
    eps = 1e-5
    scale = params["bn_gamma"] / jnp.sqrt(params["bn_var"] + eps)
    w1_eff = (w1_conv * scale[:, None]).astype(jnp.float32)         # (C, Cin)
    b1_eff = (params["bn_beta"] - params["bn_mean"] * scale)[:, None]  # (C, 1)
    b1_eff = b1_eff.astype(jnp.float32)
    w2 = params["w2"].astype(jnp.float32)                # (C, C)
    b2 = params["b2"][:, None].astype(jnp.float32)       # (C, 1)

    # ---- layout prep: pure reshapes, no HBM transpose of the big tensor ----
    x = feat_ffm.reshape(N, Cin, HW)
    q = coarse_x.reshape(N, D, HW)

    # Pad D to a sublane multiple of 8; zero q rows contribute nothing to
    # energy or to attn^T @ q.
    Dp = _round_up(D, 8)
    if Dp != D:
        q = jnp.pad(q, ((0, 0), (0, Dp - D), (0, 0)))

    # Lane-dense HW tiling (multiple of 128).  Zero-padded q keeps energy and
    # the attended output exact; padded output columns are sliced off.
    hw_tile = max(128, (int(hw_tile) // 128) * 128)
    hw_tile = min(hw_tile, _round_up(HW, 128))
    HWp = _round_up(HW, hw_tile)
    if HWp != HW:
        x = jnp.pad(x, ((0, 0), (0, 0), (0, HWp - HW)))
        q = jnp.pad(q, ((0, 0), (0, 0), (0, HWp - HW)))
    n_hw = HWp // hw_tile

    if matmul_dtype is not None:
        x = x.astype(matmul_dtype)
        q = q.astype(matmul_dtype)
        w1_eff = w1_eff.astype(matmul_dtype)
        w2 = w2.astype(matmul_dtype)

    itemsize = jnp.dtype(x.dtype).itemsize
    # rough per-step VMEM need: double-buffered input/output tiles + resident
    # weights + scratch; clamp to v7x-safe 64 MiB ceiling.
    tile_io_bytes = (Cin + Dp + C) * hw_tile * max(itemsize, 4)
    const_bytes = (C * Cin + C * C + 2 * C + Dp * C) * 4
    vmem_limit = int(min(64 * 2**20,
                         max(8 * 2**20, 4 * tile_io_bytes + 2 * const_bytes
                             + (2 << 20))))

    # ---------------- phase 1: energy + softmax -> attention ----------------
    attn = pl.pallas_call(
        _energy_kernel,
        out_shape=jax.ShapeDtypeStruct((N, Dp, C), jnp.float32),
        grid_spec=pltpu.PrefetchScalarGridSpec(
            num_scalar_prefetch=0,
            grid=(N, n_hw),
            in_specs=[
                pl.BlockSpec((1, Cin, hw_tile), lambda n, t: (n, 0, t)),
                pl.BlockSpec((1, Dp, hw_tile), lambda n, t: (n, 0, t)),
                # constant index_map -> DMA'd once, stays VMEM-resident
                pl.BlockSpec((C, Cin), lambda n, t: (0, 0)),
                pl.BlockSpec((C, 1), lambda n, t: (0, 0)),
            ],
            out_specs=pl.BlockSpec((1, Dp, C), lambda n, t: (n, 0, 0)),
            scratch_shapes=[pltpu.VMEM((Dp, C), jnp.float32)],
        ),
        compiler_params=pltpu.CompilerParams(
            dimension_semantics=("parallel", "arbitrary"),
            vmem_limit_bytes=vmem_limit),
        cost_estimate=pl.CostEstimate(
            flops=2 * N * HWp * C * (Cin + Dp),
            transcendentals=N * Dp * C,
            bytes_accessed=(N * HWp * (Cin + Dp) * itemsize
                            + (C * Cin + C) * 4 + N * Dp * C * 4)),
    )(x, q, w1_eff, b1_eff)

    # ---------------- phase 2: attended output + conv2 ----------------------
    out_flat = pl.pallas_call(
        _output_kernel,
        out_shape=jax.ShapeDtypeStruct((N, C, HWp), jnp.float32),
        grid_spec=pltpu.PrefetchScalarGridSpec(
            num_scalar_prefetch=0,
            grid=(N, n_hw),
            in_specs=[
                pl.BlockSpec((1, Dp, C), lambda n, t: (n, 0, 0)),
                pl.BlockSpec((1, Dp, hw_tile), lambda n, t: (n, 0, t)),
                pl.BlockSpec((C, C), lambda n, t: (0, 0)),
                pl.BlockSpec((C, 1), lambda n, t: (0, 0)),
            ],
            out_specs=pl.BlockSpec((1, C, hw_tile), lambda n, t: (n, 0, t)),
        ),
        compiler_params=pltpu.CompilerParams(
            # both axes independent -> both v7x TensorCores get work at small N
            dimension_semantics=("parallel", "parallel"),
            vmem_limit_bytes=vmem_limit),
        cost_estimate=pl.CostEstimate(
            flops=2 * N * HWp * C * (Dp + C),
            transcendentals=0,
            bytes_accessed=(N * HWp * (Dp + C) * itemsize
                            + (C * C + C) * 4 + N * Dp * C * 4)),
    )(attn, q, w2, b2)

    if HWp != HW:
        out_flat = out_flat[:, :, :HW]
    return out_flat.reshape(N, C, H, W)


# --------------------------------------------------------------------------
# Pure-JAX reference mirroring the PyTorch forward (inference mode)
# --------------------------------------------------------------------------
def dfe_reference(feat_ffm, coarse_x, params):
    N, Cin, H, W = feat_ffm.shape
    _, D, _, _ = coarse_x.shape
    eps = 1e-5
    scale = params["bn_gamma"] / jnp.sqrt(params["bn_var"] + eps)
    f = jnp.einsum("ncHW,oc->noHW", feat_ffm, params["w1"])
    f = f * scale[None, :, None, None] + (
        params["bn_beta"] - params["bn_mean"] * scale)[None, :, None, None]
    f = jnp.maximum(f, 0.0)
    C = f.shape[1]
    proj_query = coarse_x.reshape(N, D, -1)
    proj_key = f.reshape(N, C, -1).transpose(0, 2, 1)
    energy = jnp.einsum("ndk,nkc->ndc", proj_query, proj_key)
    energy_new = jnp.max(energy, axis=-1, keepdims=True) - energy
    attention = jax.nn.softmax(energy_new, axis=-1)
    attention = attention.transpose(0, 2, 1)
    out = jnp.einsum("ncd,ndk->nck", attention, proj_query)
    out = out.reshape(N, C, H, W)
    out = jnp.einsum("ncHW,oc->noHW", out, params["w2"]) + \
        params["b2"][None, :, None, None]
    return out


if __name__ == "__main__":
    # Small shapes consistent with the module.
    N, Cin, C, D, H, W = 2, 4, 8, 6, 16, 16

    key = jax.random.PRNGKey(0)
    k = jax.random.split(key, 6)
    feat_ffm = jax.random.normal(k[0], (N, Cin, H, W), jnp.float32)
    coarse_x = jax.random.normal(k[1], (N, D, H, W), jnp.float32)

    params = {
        "w1": jax.random.normal(k[2], (C, Cin), jnp.float32) * 0.1,
        "bn_gamma": jnp.ones((C,), jnp.float32),
        "bn_beta": jnp.zeros((C,), jnp.float32),
        "bn_mean": jnp.zeros((C,), jnp.float32),
        "bn_var": jnp.ones((C,), jnp.float32),
        "w2": jax.random.normal(k[3], (C, C), jnp.float32) * 0.1,
        "b2": jax.random.normal(k[4], (C,), jnp.float32) * 0.1,
    }

    ref = dfe_reference(feat_ffm, coarse_x, params)

    # hw_tile=128 exercises the multi-tile energy accumulation path (HW=256).
    out = dfe_forward(feat_ffm, coarse_x, params, hw_tile=128)
    out = jax.block_until_ready(out)
    assert out.shape == (N, C, H, W)
    assert jnp.allclose(out, ref, atol=1e-4, rtol=1e-4), \
        float(jnp.max(jnp.abs(out - ref)))

    # Production-style bf16 matmul path (f32 accumulation); looser tolerance
    # because the HW-length energy contraction is computed in bf16.
    out_bf16 = dfe_forward(feat_ffm, coarse_x, params, hw_tile=128,
                           matmul_dtype=jnp.bfloat16)
    out_bf16 = jax.block_until_ready(out_bf16)
    assert jnp.allclose(out_bf16, ref, atol=5e-2, rtol=5e-2), \
        float(jnp.max(jnp.abs(out_bf16 - ref)))

    print("KERNEL_OK")
</pallas_src>

<mosaic_0001>
module attributes {stable_mosaic.version = 11 : i64} {
  func.func @_energy_kernel(%arg0: i32, %arg1: i32, %arg2: memref<1x4x128xf32, #tpu.memory_space<vmem>>, %arg3: memref<1x8x128xf32, #tpu.memory_space<vmem>>, %arg4: memref<8x4xf32, #tpu.memory_space<vmem>>, %arg5: memref<8x1xf32, #tpu.memory_space<vmem>>, %arg6: memref<1x8x8xf32, #tpu.memory_space<vmem>>, %arg7: memref<8x8xf32, #tpu.memory_space<vmem>>) attributes {dimension_semantics = [#tpu.dimension_semantics<parallel>, #tpu.dimension_semantics<arbitrary>], iteration_bounds = array<i64: 2, 2>, scalar_prefetch = 0 : i64, scratch_operands = 1 : i64, tpu.core_type = #tpu.core_type<tc>, window_params = [{transform_indices = @transform_0, window_bounds = array<i64: 1, 4, 128>}, {transform_indices = @transform_1, window_bounds = array<i64: 1, 8, 128>}, {pipeline_mode = #tpu.pipeline_mode<synchronous>, transform_indices = @transform_2, window_bounds = array<i64: 8, 4>}, {pipeline_mode = #tpu.pipeline_mode<synchronous>, transform_indices = @transform_3, window_bounds = array<i64: 8, 1>}, {transform_indices = @transform_4, window_bounds = array<i64: 1, 8, 8>}]} {
    %c0_i32 = arith.constant 0 : i32
    %0 = arith.cmpi eq, %arg1, %c0_i32 : i32
    %1 = arith.extui %0 : i1 to i32
    %c0_i32_0 = arith.constant 0 : i32
    %2 = arith.cmpi ne, %1, %c0_i32_0 : i32
    scf.if %2 {
      %cst_17 = arith.constant 0.000000e+00 : f32
      %21 = vector.broadcast %cst_17 : f32 to vector<8x8xf32>
      %c0_18 = arith.constant 0 : index
      %c0_19 = arith.constant 0 : index
      %22 = vector.load %arg7[%c0_18, %c0_19] : memref<8x8xf32, #tpu.memory_space<vmem>>, vector<8x8xf32>
      tpu.vector_store %arg7[%c0_18, %c0_19], %21 {strides = array<i32>} : memref<8x8xf32, #tpu.memory_space<vmem>>, vector<8x8xf32>,
    } else {
    }
    %c0 = arith.constant 0 : index
    %c0_1 = arith.constant 0 : index
    %c0_2 = arith.constant 0 : index
    %3 = vector.load %arg2[%c0, %c0_1, %c0_2] : memref<1x4x128xf32, #tpu.memory_space<vmem>>, vector<1x4x128xf32>
    %4 = vector.shape_cast %3 : vector<1x4x128xf32> to vector<4x128xf32>
    %c0_3 = arith.constant 0 : index
    %c0_4 = arith.constant 0 : index
    %c0_5 = arith.constant 0 : index
    %5 = vector.load %arg3[%c0_3, %c0_4, %c0_5] : memref<1x8x128xf32, #tpu.memory_space<vmem>>, vector<1x8x128xf32>
    %6 = vector.shape_cast %5 : vector<1x8x128xf32> to vector<8x128xf32>
    %c0_6 = arith.constant 0 : index
    %c0_7 = arith.constant 0 : index
    %7 = vector.load %arg4[%c0_6, %c0_7] : memref<8x4xf32, #tpu.memory_space<vmem>>, vector<8x4xf32>
    %cst = arith.constant dense<0.000000e+00> : vector<8x128xf32>
    %8 = tpu.matmul %7, %4, %cst {dimension_numbers = #tpu.dot_dimension_numbers<[1], [0], [0], [1], [0, 0, 1, 1], [], []>} : vector<8x4xf32>, vector<4x128xf32>, vector<8x128xf32> -> vector<8x128xf32>
    %c0_8 = arith.constant 0 : index
    %c0_9 = arith.constant 0 : index
    %9 = vector.load %arg5[%c0_8, %c0_9] : memref<8x1xf32, #tpu.memory_space<vmem>>, vector<8x1xf32>
    %10 = vector.broadcast %9 : vector<8x1xf32> to vector<8x128xf32>
    %11 = arith.addf %8, %10 : vector<8x128xf32>
    %cst_10 = arith.constant 0.000000e+00 : f32
    %12 = vector.broadcast %cst_10 : f32 to vector<8x128xf32>
    %13 = arith.maximumf %11, %12 : vector<8x128xf32>
    %c0_11 = arith.constant 0 : index
    %c0_12 = arith.constant 0 : index
    %14 = vector.load %arg7[%c0_11, %c0_12] : memref<8x8xf32, #tpu.memory_space<vmem>>, vector<8x8xf32>
    %cst_13 = arith.constant dense<0.000000e+00> : vector<8x8xf32>
    %15 = tpu.matmul %6, %13, %cst_13 {dimension_numbers = #tpu.dot_dimension_numbers<[1], [1], [0], [0], [0, 0, 1, 0], [], []>} : vector<8x128xf32>, vector<8x128xf32>, vector<8x8xf32> -> vector<8x8xf32>
    %16 = arith.addf %14, %15 : vector<8x8xf32>
    %c0_14 = arith.constant 0 : index
    %c0_15 = arith.constant 0 : index
    %17 = vector.load %arg7[%c0_14, %c0_15] : memref<8x8xf32, #tpu.memory_space<vmem>>, vector<8x8xf32>
    tpu.vector_store %arg7[%c0_14, %c0_15], %16 {strides = array<i32>} : memref<8x8xf32, #tpu.memory_space<vmem>>, vector<8x8xf32>,
    %c1_i32 = arith.constant 1 : i32
    %18 = arith.cmpi eq, %arg1, %c1_i32 : i32
    %19 = arith.extui %18 : i1 to i32
    %c0_i32_16 = arith.constant 0 : i32
    %20 = arith.cmpi ne, %19, %c0_i32_16 : i32
    scf.if %20 {
      %c0_17 = arith.constant 0 : index
      %c0_18 = arith.constant 0 : index
      %21 = vector.load %arg7[%c0_17, %c0_18] : memref<8x8xf32, #tpu.memory_space<vmem>>, vector<8x8xf32>
      %cst_19 = arith.constant 0.000000e+00 : f32
      %22 = vector.broadcast %cst_19 : f32 to vector<8x8xf32>
      %23 = arith.subf %22, %21 : vector<8x8xf32>
      %cst_20 = arith.constant dense<0xFF800000> : vector<8xf32>
      %24 = vector.multi_reduction <maximumf>, %23, %cst_20 [1] : vector<8x8xf32> to vector<8xf32>
      %25 = vector.shape_cast %24 : vector<8xf32> to vector<8x1xf32>
      %26 = vector.broadcast %25 : vector<8x1xf32> to vector<8x8xf32>
      %27 = arith.subf %23, %26 : vector<8x8xf32>
      %28 = math.exp %27 : vector<8x8xf32>
      %cst_21 = arith.constant dense<0.000000e+00> : vector<8xf32>
      %29 = vector.multi_reduction <add>, %28, %cst_21 [1] : vector<8x8xf32> to vector<8xf32>
      %30 = vector.shape_cast %29 : vector<8xf32> to vector<8x1xf32>
      %31 = vector.broadcast %30 : vector<8x1xf32> to vector<8x8xf32>
      %32 = arith.divf %28, %31 : vector<8x8xf32>
      %c0_22 = arith.constant 0 : index
      %c0_23 = arith.constant 0 : index
      %c0_24 = arith.constant 0 : index
      %33 = vector.load %arg6[%c0_22, %c0_23, %c0_24] : memref<1x8x8xf32, #tpu.memory_space<vmem>>, vector<1x8x8xf32>
      %34 = vector.shape_cast %33 : vector<1x8x8xf32> to vector<8x8xf32>
      %35 = vector.shape_cast %32 : vector<8x8xf32> to vector<1x8x8xf32>
      tpu.vector_store %arg6[%c0_22, %c0_23, %c0_24], %35 {strides = array<i32>} : memref<1x8x8xf32, #tpu.memory_space<vmem>>, vector<1x8x8xf32>,
    } else {
    }
    return
  }
  func.func @transform_0(%arg0: i32, %arg1: i32) -> (i32, i32, i32) {
    %c0_i32 = arith.constant 0 : i32
    %c0_i32_0 = arith.constant 0 : i32
    return %arg0, %c0_i32, %arg1 : i32, i32, i32
  }
  func.func @transform_1(%arg0: i32, %arg1: i32) -> (i32, i32, i32) {
    %c0_i32 = arith.constant 0 : i32
    %c0_i32_0 = arith.constant 0 : i32
    return %arg0, %c0_i32, %arg1 : i32, i32, i32
  }
  func.func @transform_2(%arg0: i32, %arg1: i32) -> (i32, i32) {
    %c0_i32 = arith.constant 0 : i32
    %c0_i32_0 = arith.constant 0 : i32
    %c0_i32_1 = arith.constant 0 : i32
    return %c0_i32, %c0_i32_0 : i32, i32
  }
  func.func @transform_3(%arg0: i32, %arg1: i32) -> (i32, i32) {
    %c0_i32 = arith.constant 0 : i32
    %c0_i32_0 = arith.constant 0 : i32
    %c0_i32_1 = arith.constant 0 : i32
    return %c0_i32, %c0_i32_0 : i32, i32
  }
  func.func @transform_4(%arg0: i32, %arg1: i32) -> (i32, i32, i32) {
    %c0_i32 = arith.constant 0 : i32
    %c0_i32_0 = arith.constant 0 : i32
    %c0_i32_1 = arith.constant 0 : i32
    return %arg0, %c0_i32, %c0_i32_0 : i32, i32, i32
  }
}

</mosaic_0001>

<bundles_post_ra>
// kernel: tpu_custom_call.1
= control target key start
LH: loop header
LB: loop body
LE: loop exit
PB: predicated region body
PF: predicated region fallthrough
CT: control target
= control target key end

     0   :  { %9 = vsyncpa [#allocation4], 0  ;;  %s989_s0 = inlined_call_operand.vmem [shape: f32[2,4,256], index: 0, kind: input, shape index: {}]   ;;  %s990_s1 = inlined_call_operand.hbm [shape: f32[2,8,256], index: 1, kind: input, shape index: {}]   ;;  %s991_s2 = inlined_call_operand.vmem [shape: f32[8,4], index: 2, kind: input, shape index: {}]   ;;  %s992_s3 = inlined_call_operand.vmem [shape: f32[8,1], index: 3, kind: input, shape index: {}]   ;;  %s993_s4 = inlined_call_operand.hbm [shape: f32[2,8,8], index: 4, kind: output, shape index: {}]  }
   0x1   :  { %11 = vsyncpa [#allocation4 + $0x1], 0 }
   0x2   :  { %12 = vsyncpa [#allocation5], 0 }
   0x3   :  { %14 = vsyncpa [#allocation5 + $0x1], 0  ;;  %s788_s15 = smov 0   ;;  %s790_s16 = smov 0  }
   0x4   :  { %s792_s17 = smov 0   ;;  %s794_s18 = smov 0  }
   0x5   :  { %s796_s19 = smov 0   ;;  %s798_s20 = smov 0  }
   0x6   :  { %s800_s21 = smov 0   ;;  %s802_s22 = smov 0  }
   0x7   :  { %s804_s23 = smov 0   ;;  %s806_s24 = smov 0  }
   0x8   :  { %s808_s25 = smov 0  }
   0x9 LB: > { %s478_s26 = sadd.s32 4294967295, %s759_s25   ;;  %s479_s27 = sadd.s32 4294967294, %s759_s25   ;;  %s759_s25 = sphi %s808_s25, %s20_s25   ;;  %s755_s24 = sphi %s806_s24, %s1019_s24   ;;  %s751_s23 = sphi %s804_s23, %s1018_s23   ;;  %s747_s22 = sphi %s802_s22, %s1017_s22   ;;  %s743_s21 = sphi %s800_s21, %s1016_s21   ;;  %s739_s20 = sphi %s798_s20, %s1015_s20   ;;  %s735_s19 = sphi %s796_s19, %s1014_s19   ;;  %s731_s18 = sphi %s794_s18, %s1013_s18   ;;  %s727_s17 = sphi %s792_s17, %s1012_s17   ;;  %s723_s16 = sphi %s790_s16, %s1011_s16   ;;  %s719_s15 = sphi %s788_s15, %s1010_s15  }
   0xa   : > { %s29_s28 = sadd.s32 1, %s751_s23  ;;  %s32_s29 = sadd.s32 1, %s755_s24 }
   0xb   : > { %p30_p0 = scmp.ge.s32.totalorder %s29_s28, 2  ;;  %s69_s30 = sadd.s32 1, %s739_s20 }
   0xc   : > { %p76_p1 = scmp.ne.s32.totalorder %s739_s20, %s735_s19  ;;  %p77_p2 = scmp.eq.s32.totalorder %s759_s25, 0 }
   0xd   : > { %s1021_s28 = smov (%p30_p0, %s29_s28), 0  ;;  %s1023_s29 = smov (!%p30_p0, %s32_s29), %s755_s24 }
   0xe   : > { %997 = sst [smem:[#allocation9_spill]] %s1021_s28  ;;  %s65_s5 = ssub.s32 %s751_s23, %s1021_s28 }
   0xf   : > { %p854_p3 = por %p77_p2, %p76_p1  ;;  %p34_p4 = scmp.ge.s32.totalorder %s1023_s29, 2 }
  0x10   : > { %p82_p5 = scmp.ne.s32.totalorder %s735_s19, %s731_s18  ;;  %p83_p6 = scmp.eq.s32.totalorder %s478_s26, 0 }
  0x11   : > { %s137_s7 = sadd.s32 1, %s727_s17  ;;  %s1025_s29 = smov (%p34_p4, %s1023_s29), 0 }
  0x12   : > { %999 = sst [smem:[#allocation10_spill]] %s1025_s29  ;;  %p862_p7 = por %p83_p6, %p82_p5 }
  0x13   : > { %p147_p8 = scmp.ne.s32.totalorder %s727_s17, %s723_s16  ;;  %s64_s9 = ssub.s32 %s755_s24, %s1025_s29 }
  0x14   : > { %p148_p9 = scmp.eq.s32.totalorder %s478_s26, 3  ;;  %s66_s10 = sor.u32 %s65_s5, %s64_s9 }
  0x15   : > { %p135_p10 = scmp.eq.s32.totalorder %s64_s9, 0  ;;  %p67_p11 = scmp.eq.s32.totalorder %s66_s10, 0 }
  0x16   : > { %p870_p12 = por %p148_p9, %p147_p8  ;;  %p153_p13 = scmp.ne.s32.totalorder %s723_s16, %s719_s15 }
  0x17   : > { %s875_s12 = scalar_select %p135_p10, %s727_s17, %s137_s7  }
  0x18   : > { %s878_s13 = scalar_select %p67_p11, %s739_s20, %s69_s30  }
  0x19   : > { %1002 = sst [smem:[#allocation11_spill]] %s875_s12  ;;  %p154_p0 = scmp.eq.s32.totalorder %s479_s27, 3 }
  0x1a   : > { %1003 = sst [smem:[#allocation12_spill]] %s878_s13  ;;  %p510_p1 = scmp.lt.s32.totalorder %s759_s25, 4 }
  0x1b   : > { %p883_p2 = por %p154_p0, %p153_p13  ;;  %s191_s18 = sand.u32 1, %s739_s20  }
  0x1c   : > { %s482_s26 = sshll.u32 %s191_s18, 3  ;;  %s483_s5 = sshll.u32 %s755_s24, 1 }
  0x1d   : > { %s199_s9 = sadd.s32 %s751_s23, %s483_s5  ;;  %s195_s10 = scalar_lea.vmem [#allocation3], %s482_s26 }
  0x1e   : > { %s205_s29 = sshll.u32 %s195_s10, 4  ;;  %s484_s28 = sshll.u32 %s199_s9, 3  ;;  %s206_s29 = int_to_ptr.vmem [resolvable:$true] %s205_s29 }
  0x1f   : > { %s201_s13 = scalar_lea.hbm %s990_s1, %s484_s28  ;;  %p503_p4 = pnand %p510_p1, %p854_p3 }
  0x20   : > { %s203_s27 = sshll.u32 %s201_s13, 4  ;;  %p485_p5 = scmp.ge.s32.totalorder %s759_s25, 1  ;;  %s204_s27 = int_to_ptr.hbm [resolvable:$true] %s203_s27 }
  0x21   : > { %s192_s12 = scalar_lea.sflag [#allocation4], %s191_s18  ;;  %p210_p6 = scmp.lt.s32.totalorder %s759_s25, 5 }
  0x22   : > { %505 = dma.hbm_to_vmem [thread:$0]  (!%p503_p4), %s204_s27, 128, %s206_s29, %s192_s12  }
  0x23   : > { %p211_p8 = pnand %p485_p5, %p210_p6 }
  0x24   : > { %s216_s26 = sand.u32 (!%p211_p8), 1, %s735_s19  }
  0x25   : > { %214 = sbr.rel (%p211_p8) target bundleno = 610 (0x262), region = 36  ;;  %s898_s5 = sshll.u32 (!%p211_p8), %s216_s26, 3 }
  0x26   : > { %s217_s9 = scalar_lea.sflag (!%p211_p8), [#allocation4], %s216_s26  ;;  %s220_s10 = scalar_lea.vmem (!%p211_p8), [#allocation3], %s898_s5 }
  0x2a   : > { %710 = dma.done.wait (%p862_p7), %s217_s9, 128  }
  0x2b   : > { %712 = vsyncadd (%p862_p7), %s217_s9, 4294967168  ;;  %s996_s28 = sand.u32 1, %s723_s16   ;;  %p254_p3 = scmp.lt.s32.totalorder %s747_s22, 1 }
  0x2c   : > { %s909_s29 = sshll.u32 %s996_s28, 3  ;;  %p256_p9 = scmp.lt.s32.totalorder %s743_s21, 1 }
  0x2d   : > { %s255_s6 = scalar_select %p254_p3, %s747_s22, 1 }
  0x2e   : > { %s257_s12 = scalar_select %p256_p9, %s743_s21, 1 }
  0x2f   : > { %s488_s13 = sshll.u32 %s255_s6, 1  ;;  %s253_s26 = scalar_lea.vmem [#allocation6], %s909_s29 }
  0x30   : > { %s259_s18 = sadd.s32 %s488_s13, %s257_s12  ;;  %p490_p7 = scmp.ne.s32.totalorder %s743_s21, 0 }
  0x31   : > { %s489_s7 = sshll.u32 %s259_s18, 2 }
  0x32   : > { %s261_s27 = scalar_lea.vmem %s989_s0, %s489_s7  ;;  %265 = sbr.rel (%p490_p7) target bundleno = 57 (0x39), region = 44 }
  0x37   : > { %vm266_vm0 = vcmask 64512   ;;  %v761_v0 = vmov 0.0  }
  0x38   : > { %267 = vst.msk [vmem:[#allocation2] sm:$0xff] %vm266_vm0, %v761_v0 }
  0x39 PF: > { %v268_v1 = vld [vmem:[%s261_s27] sm:$0xf]  ;;  %vm281_vm1 = vcmask 1043456   ;;  %vm277_vm2 = vcmask 31744   ;;  %v762_v3 = vmov 0   ;;  %v269_v9 = vld [vmem:[%s220_s10] sm:$0xff] }
  0x3a   : > { %v270_v2 = vld [vmem:[%s991_s2] sm:$0xff]  ;;  %491 = vmatpush.msk.msra.mxu0 %vm281_vm1, %v268_v1  ;;  %602 = vset.pattern.permute.xlu0 %v762_v3  ;;  %vm328_vm3 = vcmask 64512   ;;  %p493_p10 = scmp.ne.s32.totalorder %s743_s21, 1 }
  0x3b   : > { %v271_v4 = vld [vmem:[%s992_s3] sm:$0xff]  ;;  %492 = vmatmul.msk.f32.vlgmr.msra.gmra.mxu0 %vm277_vm2, %v270_v2 }
  0x3c   : > { %274 = vperm.xlu0 %602, %v271_v4  }
  0x3f   : > { %v306_v10 = vld [vmem:[#allocation2] sm:$0xff] }
  0xae   : > { %v275_v5 = vpop.permute.xlu0 %274 }
  0xb8   : > { %v302_v6 = vpop.f32.mrf.mxu0 }
  0xb9   : > { %v303_v7 = vadd.f32 %v302_v6, %v275_v5 }
  0xbb   : > { %v305_v8 = vmax.f32 %v303_v7, 0.0 }
  0xbd   : > { %322 = vmatpush.xpose.msra.mxu1 %v305_v8 }
  0xc0   : > { %323 = vmatmul.f32.vlgmr.msra.gmra.mxu1 %v269_v9 }
 0x13c   : > { %333 = sbr.rel (%p493_p10) target bundleno = 595 (0x253), region = 48 }
 0x13d   : > { %v324_v11 = vpop.f32.mrf.mxu1 }
 0x13e   : > { %v327_v12 = vadd.f32 %v324_v11, %v306_v10 }
 0x140   : > { %329 = vst.msk [vmem:[#allocation2] sm:$0xff] %vm328_vm3, %v327_v12 }
 0x147   : > { %v334_v13 = vld [vmem:[#allocation2] sm:$0xff] }
 0x148   : > { %v335_v14 = vsub.f32 0.0, %v334_v13 }
 0x14a   : > { %v336_v15 = vsel %vm328_vm3, %v335_v14, -inf }
 0x14b   : > { %337 = vmax.xlane.f32.xlu0 %v336_v15 }
 0x1be   : > { %v338_v16 = vpop.xlane.xlu0 %337 }
 0x1bf   : > { %v339_v17 = vsub.f32 %v335_v14, %v338_v16 }
 0x1c1   : > { %v340_v18 = vmul.f32 1.442695, %v339_v17 }
 0x1c3   : > { %603 = vpow2.f32 %v340_v18 }
 0x1c9   : > { %v604_v19 = vpop.eup %603 }
 0x1ca   : > { %v342_v20 = vsel %vm328_vm3, %v604_v19, 0.0 }
 0x1cb   : > { %343 = vadd.xlane.f32.xlu0 %v342_v20 }
 0x23e   : > { %v344_v21 = vpop.xlane.xlu0 %343 }
 0x23f   : > { %605 = vrcp.f32 %v344_v21  ;;  %v356_v25 = vand.u32 2147483648, %v344_v21  ;;  %v354_v27 = vand.u32 2147483647, %v344_v21  ;;  %vm350_vm5 = vweird.f32 %v344_v21 }
 0x241   : > { %v357_v29 = vor.u32 1.1754944e-38, %v356_v25  ;;  %vm355_vm7 = vcmp.eq.f32.partialorder %v354_v27, 8.507059e+37 }
 0x245   : > { %v606_v22 = vpop.eup %605 }
 0x246   : > { %v346_v23 = vmul.f32 %v606_v22, %v344_v21  ;;  %vm351_vm4 = vweird.f32 %v606_v22 }
 0x247   : > { %vm352_vm6 = vmor %vm350_vm5, %vm351_vm4 }
 0x248   : > { %v347_v24 = vsub.f32 1.0, %v346_v23 }
 0x24a   : > { %v348_v26 = vmul.f32 %v606_v22, %v347_v24 }
 0x24c   : > { %v349_v28 = vadd.f32 %v606_v22, %v348_v26 }
 0x24e   : > { %v353_v30 = vsel %vm352_vm6, %v606_v22, %v349_v28 }
 0x24f   : > { %v358_v31 = vsel %vm355_vm7, %v357_v29, %v353_v30 }
 0x250   : > { %v359_v32 = vmul.f32 %v604_v19, %v358_v31 }
 0x252   : > { %360 = vst.msk [vmem:[%s253_s26] sm:$0xff] %vm328_vm3, %v359_v32 }
 0x253 PF: > { %s495_s21 = sshll.u32 %s747_s22, 3  ;;  %s374_s13 = sshll.u32 %s253_s26, 4  ;;  %s375_s13 = int_to_ptr.vmem [resolvable:$true] %s374_s13 }
 0x254   : > { %s372_s28 = scalar_lea.hbm %s993_s4, %s495_s21  ;;  %s1005_s7 = sand.u32 1, %s723_s16  }
 0x255   : > { %s376_s18 = sshll.u32 %s372_s28, 4  ;;  %s362_s8 = scalar_lea.sflag [#allocation5], %s1005_s7  ;;  %s377_s18 = int_to_ptr.hbm [resolvable:$true] %s376_s18 }
 0x256   : > { %s651_s30 = sshra.s32 %s377_s18, 4  ;;  %s657_s6 = scalar_lea.hbm %s993_s4, 16  ;;  %s652_s30 = int_to_ptr.hbm [resolvable:$true] %s651_s30 }
 0x257   : > { %s653_s27 = scalar_lea.hbm %s652_s30, 8  ;;  %p658_p1 = scmp.lt.s32.totalorder %s652_s30, %s993_s4 }
 0x258   : > { %p654_p11 = scmp.ne.s32.totalorder %s652_s30, %s653_s27  ;;  %p659_p4 = scmp.lt.s32.totalorder %s657_s6, %s653_s27 }
 0x25a   : > { %p655_p13 = pnand %p654_p11, %p870_p12  ;;  %p660_p5 = por %p659_p4, %p658_p1 }
 0x25c   : > { %p656_p0 = pneg %p655_p13 }
 0x25e   : > { %p661_p6 = pnand %p660_p5, %p656_p0 }
 0x260   : > { %664 = shalt.err (!%p661_p6)
}
 0x261   : > { %500 = dma.vmem_to_hbm [thread:$0]  (%p870_p12), %s375_s13, 128, %s377_s18, %s362_s8  }
 0x262 PF: > { %p511_p8 = scmp.ge.s32.totalorder %s759_s25, 2  ;;  %s388_s29 = sand.u32 1, %s719_s15  }
 0x263   : > { %s389_s26 = scalar_lea.sflag [#allocation5], %s388_s29 }
 0x264   : > { %p507_p3 = pnand %p511_p8, %p883_p2 }
 0x266   : > { %p508_p9 = pneg %p507_p3 }
 0x268   : > { %714 = dma.done.wait (%p508_p9), %s389_s26, 128  }
 0x269   : > { %716 = vsyncadd (%p508_p9), %s389_s26, 4294967168  ;;  %s20_s25 = sadd.s32 1, %s759_s25   ;;  %s1006_s5 = sld [smem:[#allocation11_spill]] }
 0x26a   : > { %p17_p7 = scmp.ge.s32.totalorder %s20_s25, 6   ;;  %s1007_s11 = sld [smem:[#allocation12_spill]] }
 0x26b   : > { %s1008_s10 = sld [smem:[#allocation9_spill]]  ;;  %s1010_s15 = smov %s723_s16 }
 0x26c   : > { %s1009_s28 = sld [smem:[#allocation10_spill]]  ;;  %s1011_s16 = smov %s727_s17 }
 0x26d   : > { %s1013_s18 = smov %s735_s19  ;;  %s1014_s19 = smov %s739_s20 }
 0x26e   : > { %s1016_s21 = smov %s751_s23  ;;  %s1017_s22 = smov %s755_s24 }
 0x26f   : > { %s1012_s17 = smov %s1006_s5  ;;  %19 = sbr.rel (!%p17_p7) target bundleno = 9 (0x9), region = 92 }
 0x270   : > { %s1015_s20 = smov %s1007_s11 }
 0x271   : > { %s1018_s23 = smov %s1008_s10 }
 0x272   : > { %s1019_s24 = smov %s1009_s28 }
 0x274   :  { %395 = vsyncpa [#allocation4], 1 }
 0x275   :  { %397 = vsyncpa [#allocation4 + $0x1], 1 }
 0x276   :  { %398 = vsyncpa [#allocation5], 1 }
 0x277   :  { %400 = vsyncpa [#allocation5 + $0x1], 1 }

</bundles_post_ra>
